<compile_context>
chip_gen: v7x
topology: tpu7x:2x2x1
jax: 0.10.0
libtpu: 0.0.40
codegen_flags: <defaults>
</compile_context>

<pallas_src>
import numpy as np

import jax
import jax.numpy as jnp
from jax import lax
from jax.experimental import pallas as pl
from jax.experimental.pallas import tpu as pltpu


def _pick_tile(n, target, multiple=128):
    """Largest tile <= target that divides n and is a multiple of `multiple`.
    Falls back to the full dimension (a single full block is always legal)."""
    if n <= target:
        return n
    t = (min(target, n) // multiple) * multiple
    while t >= multiple:
        if n % t == 0:
            return t
        t -= multiple
    return n


def _linear_t_kernel(w_ref, x_ref, o_ref):
    # o[h, n] = sum_k W[h, k] * x[n, k]  == (x @ W.T).T ; lane dim = n (dense).
    o_ref[...] = lax.dot_general(
        w_ref[...], x_ref[...],
        dimension_numbers=(((1,), (1,)), ((), ())),
        preferred_element_type=jnp.float32,
    ).astype(o_ref.dtype)


def _propagate_kernel(xw_ref, a_ref, b_ref, o_ref, acc_ref):
    # Accumulate outT[h, m] = sum_n xwT[h, n] * A[m, n]  (same pattern as the
    # flash-attention q.k^T contraction: contract the last dims of both).
    k = pl.program_id(1)

    @pl.when(k == 0)
    def _init():
        acc_ref[...] = jnp.zeros_like(acc_ref)

    acc_ref[...] += lax.dot_general(
        xw_ref[...], a_ref[...],
        dimension_numbers=(((1,), (1,)), ((), ())),
        preferred_element_type=jnp.float32,
    )

    @pl.when(k == pl.num_programs(1) - 1)
    def _finalize():
        # f32 epilogue (bias + relu) regardless of MXU input dtype.
        z = acc_ref[...] + b_ref[...]
        # dropout_layer with p=0.0 / eval mode is the identity -> skipped.
        o_ref[...] = jnp.maximum(z, 0.0).astype(o_ref.dtype)


def ode_func_forward(A, x, W, b, *, compute_dtype=None, tm=None, tk=None, tc=None):
    """relu((A @ x) @ W.T + b) == relu(A @ (x @ W.T) + b), computed in the
    transposed [H, N] layout inside Pallas and transposed back at the end."""
    N, H = x.shape
    assert A.shape == (N, N)
    assert W.shape == (H, H)
    assert b.shape == (H,)

    out_dtype = x.dtype
    mxu_dtype = np.dtype(compute_dtype) if compute_dtype is not None else np.dtype(A.dtype)
    itemsize = mxu_dtype.itemsize

    # --- tile selection ------------------------------------------------------
    tc = tc or _pick_tile(N, 2048)   # precompute: lane tile of xW^T
    tm = tm or _pick_tile(N, 512)    # main: A row tile / outT lane tile
    tk = tk or _pick_tile(N, 1024)   # main: contraction tile over N
    assert N % tc == 0 and N % tm == 0 and N % tk == 0

    # --- kernel 1: xwT = (x @ W.T).T = W @ x.T  -> (H, N), lane-dense ---------
    xwT = pl.pallas_call(
        _linear_t_kernel,
        out_shape=jax.ShapeDtypeStruct((H, N), mxu_dtype),
        grid_spec=pltpu.PrefetchScalarGridSpec(
            num_scalar_prefetch=0,
            grid=(N // tc,),
            in_specs=[
                pl.BlockSpec((H, H), lambda j: (0, 0)),    # W resident
                pl.BlockSpec((tc, H), lambda j: (j, 0)),   # row tile of x
            ],
            out_specs=pl.BlockSpec((H, tc), lambda j: (0, j)),
        ),
        compiler_params=pltpu.CompilerParams(dimension_semantics=("parallel",)),
        cost_estimate=pl.CostEstimate(
            flops=2 * N * H * H,
            transcendentals=0,
            bytes_accessed=(N * H + H * H) * x.dtype.itemsize + N * H * itemsize),
    )(W, x)

    # --- kernel 2: outT = relu(xwT contracted with A + b) -> (H, N) -----------
    A_c = A.astype(mxu_dtype) if A.dtype != mxu_dtype else A
    b_col = b.reshape(H, 1).astype(jnp.float32)

    out_t = pl.pallas_call(
        _propagate_kernel,
        out_shape=jax.ShapeDtypeStruct((H, N), out_dtype),
        grid_spec=pltpu.PrefetchScalarGridSpec(
            num_scalar_prefetch=0,
            grid=(N // tm, N // tk),                         # reduction axis last
            in_specs=[
                pl.BlockSpec((H, tk), lambda m, k: (0, k)),   # xwT contraction slab
                pl.BlockSpec((tm, tk), lambda m, k: (m, k)),  # A tile
                pl.BlockSpec((H, 1), lambda m, k: (0, 0)),    # bias (resident)
            ],
            out_specs=pl.BlockSpec((H, tm), lambda m, k: (0, m)),
            scratch_shapes=[pltpu.VMEM((H, tm), jnp.float32)],
        ),
        compiler_params=pltpu.CompilerParams(
            dimension_semantics=("parallel", "arbitrary")),
        cost_estimate=pl.CostEstimate(
            flops=2 * N * N * H,
            transcendentals=0,
            bytes_accessed=N * N * itemsize + N * H * itemsize + H * 4
                           + N * H * np.dtype(out_dtype).itemsize),
    )(xwT, A_c, b_col)

    # One cheap XLA transpose back to the module's [N_node, hidden] layout.
    return out_t.T


# TODO(synk): the torch.sparse.mm branch (A.is_sparse) has no clean dense
# BlockSpec equivalent; this implements the dense-A default path only.


if __name__ == "__main__":
    N_NODE = 128   # N_node
    HIDDEN = 32    # hidden_size

    key = jax.random.PRNGKey(0)
    k_a, k_x, k_w, k_b = jax.random.split(key, 4)

    A = jax.random.normal(k_a, (N_NODE, N_NODE), dtype=jnp.float32) / jnp.sqrt(N_NODE)
    x = jax.random.normal(k_x, (N_NODE, HIDDEN), dtype=jnp.float32)
    bound = 1.0 / float(np.sqrt(HIDDEN))   # PyTorch Linear default init range
    W = jax.random.uniform(k_w, (HIDDEN, HIDDEN), minval=-bound, maxval=bound,
                           dtype=jnp.float32)
    b = jax.random.uniform(k_b, (HIDDEN,), minval=-bound, maxval=bound,
                           dtype=jnp.float32)

    ref = jnp.maximum((A @ x) @ W.T + b, 0.0)

    # f32 path (differs from the reference only by float reassociation).
    out = jax.block_until_ready(ode_func_forward(A, x, W, b))
    assert out.shape == (N_NODE, HIDDEN)
    assert jnp.allclose(out, ref, atol=1e-4, rtol=1e-4), "f32 kernel mismatch"

    # bf16-MXU-input path (v6e/v7x recommendation): f32 accumulate + f32 epilogue.
    out_bf16 = jax.block_until_ready(
        ode_func_forward(A, x, W, b, compute_dtype=jnp.bfloat16))
    assert out_bf16.shape == (N_NODE, HIDDEN)
    assert jnp.allclose(out_bf16, ref, atol=2e-2, rtol=2e-2), "bf16 kernel mismatch"

    print("KERNEL_OK")
</pallas_src>

<mosaic_0001>
module attributes {stable_mosaic.version = 11 : i64} {
  func.func @_linear_t_kernel(%arg0: i32, %arg1: memref<32x32xf32, #tpu.memory_space<vmem>>, %arg2: memref<128x32xf32, #tpu.memory_space<vmem>>, %arg3: memref<32x128xf32, #tpu.memory_space<vmem>>) attributes {dimension_semantics = [#tpu.dimension_semantics<parallel>], iteration_bounds = array<i64: 1>, scalar_prefetch = 0 : i64, scratch_operands = 0 : i64, tpu.core_type = #tpu.core_type<tc>, window_params = [{pipeline_mode = #tpu.pipeline_mode<synchronous>, transform_indices = @transform_0, window_bounds = array<i64: 32, 32>}, {transform_indices = @transform_1, window_bounds = array<i64: 128, 32>}, {transform_indices = @transform_2, window_bounds = array<i64: 32, 128>}]} {
    %c0 = arith.constant 0 : index
    %c0_0 = arith.constant 0 : index
    %0 = vector.load %arg1[%c0, %c0_0] : memref<32x32xf32, #tpu.memory_space<vmem>>, vector<32x32xf32>
    %c0_1 = arith.constant 0 : index
    %c0_2 = arith.constant 0 : index
    %1 = vector.load %arg2[%c0_1, %c0_2] : memref<128x32xf32, #tpu.memory_space<vmem>>, vector<128x32xf32>
    %cst = arith.constant dense<0.000000e+00> : vector<32x128xf32>
    %2 = tpu.matmul %0, %1, %cst {dimension_numbers = #tpu.dot_dimension_numbers<[1], [1], [0], [0], [0, 0, 1, 0], [], []>} : vector<32x32xf32>, vector<128x32xf32>, vector<32x128xf32> -> vector<32x128xf32>
    %c0_3 = arith.constant 0 : index
    %c0_4 = arith.constant 0 : index
    %3 = vector.load %arg3[%c0_3, %c0_4] : memref<32x128xf32, #tpu.memory_space<vmem>>, vector<32x128xf32>
    tpu.vector_store %arg3[%c0_3, %c0_4], %2 {strides = array<i32>} : memref<32x128xf32, #tpu.memory_space<vmem>>, vector<32x128xf32>,
    return
  }
  func.func @transform_0(%arg0: i32) -> (i32, i32) {
    %c0_i32 = arith.constant 0 : i32
    %c0_i32_0 = arith.constant 0 : i32
    %c0_i32_1 = arith.constant 0 : i32
    return %c0_i32, %c0_i32_0 : i32, i32
  }
  func.func @transform_1(%arg0: i32) -> (i32, i32) {
    %c0_i32 = arith.constant 0 : i32
    %c0_i32_0 = arith.constant 0 : i32
    return %arg0, %c0_i32 : i32, i32
  }
  func.func @transform_2(%arg0: i32) -> (i32, i32) {
    %c0_i32 = arith.constant 0 : i32
    %c0_i32_0 = arith.constant 0 : i32
    return %c0_i32, %arg0 : i32, i32
  }
}

</mosaic_0001>

<bundles_post_ra>
// kernel: tpu_custom_call.1
= control target key start
LH: loop header
LB: loop body
LE: loop exit
PB: predicated region body
PF: predicated region fallthrough
CT: control target
= control target key end

     0   :  { %vm32_vm0 = vcmask 261120   ;;  %s531_s0 = inlined_call_operand.vmem [shape: f32[32,32], index: 0, kind: input, shape index: {}]   ;;  %s532_s1 = inlined_call_operand.vmem [shape: f32[128,32], index: 1, kind: input, shape index: {}]   ;;  %s533_s2 = inlined_call_operand.hbm [shape: f32[32,128], index: 2, kind: output, shape index: {}]  }
   0x1   :  { %v16_v0 = vld [vmem:[%s532_s1] sm:$0xff]  ;;  %v17_v1 = vld [vmem:[%s532_s1 + $0x8] sm:$0xff]  ;;  %v18_v2 = vld [vmem:[%s532_s1 + $0x10] sm:$0xff] }
   0x2   :  { %v276_v3 = vpack.c.bf16 %v17_v1, %v16_v0  ;;  %vm396_vm1 = vmpackc.low %vm32_vm0, %vm32_vm0  ;;  %v19_v5 = vld [vmem:[%s532_s1 + $0x18] sm:$0xff]  ;;  %v12_v7 = vld [vmem:[%s531_s0] sm:$0xff] }
   0x3   :  { %v282_v6 = vpack.c.bf16 %v19_v5, %v18_v2  ;;  %v20_v8 = vld [vmem:[%s532_s1 + $0x20] sm:$0xff]  ;;  %v21_v9 = vld [vmem:[%s532_s1 + $0x28] sm:$0xff]  ;;  %270 = vmatprep.mubr.msk.f32.mxu0 %vm32_vm0, %v12_v7  ;;  %v14_v10 = vld [vmem:[%s531_s0 + $0x10] sm:$0xff] }
   0x4   :  { %278 = vmatprep.subr.msk.bf16.mxu0 %vm396_vm1, %v276_v3  ;;  %324 = vmatprep.subr.msk.bf16.mxu1 %vm396_vm1, %v276_v3 }
   0x5   :  { %281 = vmatpush3.bf16.xpose.msk.msra.mxu0 %vm396_vm1, %v276_v3  ;;  %332 = vmatpush3.bf16.xpose.msk.msra.mxu1 %vm396_vm1, %v276_v3 }
   0x6   :  { %284 = vmatprep.subr.msk.bf16.mxu0 %vm396_vm1, %v282_v6  ;;  %325 = vmatprep.subr.msk.bf16.mxu1 %vm396_vm1, %v282_v6 }
   0x7   :  { %273 = vmatprep.mubr.msk.f32.mxu1 %vm32_vm0, %v14_v10 }
   0x8   :  { %7 = vsyncpa [#allocation3], 0  ;;  %v288_v11 = vpack.c.bf16 %v21_v9, %v20_v8  ;;  %v22_v12 = vld [vmem:[%s532_s1 + $0x30] sm:$0xff]  ;;  %v23_v13 = vld [vmem:[%s532_s1 + $0x38] sm:$0xff]  ;;  %s367_s20 = smov [#allocation2]  }
   0x9   :  { %v294_v14 = vpack.c.bf16 %v23_v13, %v22_v12  ;;  %v24_v15 = vld [vmem:[%s532_s1 + $0x40] sm:$0xff]  ;;  %v25_v16 = vld [vmem:[%s532_s1 + $0x48] sm:$0xff]  ;;  %v26_v18 = vld [vmem:[%s532_s1 + $0x50] sm:$0xff]  ;;  %s187_s21 = sshll.u32 %s367_s20, 4  ;;  %s188_s21 = int_to_ptr.vmem [resolvable:$true] %s187_s21 }
   0xa   :  { %v300_v17 = vpack.c.bf16 %v25_v16, %v24_v15  ;;  %v27_v19 = vld [vmem:[%s532_s1 + $0x58] sm:$0xff]  ;;  %v28_v21 = vld [vmem:[%s532_s1 + $0x60] sm:$0xff]  ;;  %v29_v22 = vld [vmem:[%s532_s1 + $0x68] sm:$0xff]  ;;  %s343_s22 = scalar_lea.vmem %s188_s21, 512  ;;  %p348_p1 = scmp.lt.s32.totalorder %s188_s21, %s188_s21 }
   0xb   :  { %v306_v20 = vpack.c.bf16 %v27_v19, %v26_v18  ;;  %v312_v23 = vpack.c.bf16 %v29_v22, %v28_v21  ;;  %v30_v24 = vld [vmem:[%s532_s1 + $0x70] sm:$0xff]  ;;  %v31_v25 = vld [vmem:[%s532_s1 + $0x78] sm:$0xff]  ;;  %v13_v27 = vld [vmem:[%s531_s0 + $0x8] sm:$0xff]  ;;  %p344_p0 = scmp.ne.s32.totalorder %s188_s21, %s343_s22  ;;  %p349_p2 = scmp.lt.s32.totalorder %s343_s22, %s343_s22 }
   0xc   :  { %v318_v26 = vpack.c.bf16 %v31_v25, %v30_v24  ;;  %v15_v28 = vld [vmem:[%s531_s0 + $0x18] sm:$0xff] }
   0xd   :  { %287 = vmatpush3.bf16.xpose.msk.msra.mxu0 %vm396_vm1, %v282_v6  ;;  %333 = vmatpush3.bf16.xpose.msk.msra.mxu1 %vm396_vm1, %v282_v6  ;;  %p350_p3 = por %p349_p2, %p348_p1 }
   0xe   :  { %290 = vmatprep.subr.msk.bf16.mxu0 %vm396_vm1, %v288_v11  ;;  %326 = vmatprep.subr.msk.bf16.mxu1 %vm396_vm1, %v288_v11 }
   0xf   :  { %p351_p4 = pnand %p350_p3, %p344_p0 }
  0x15   :  { %293 = vmatpush3.bf16.xpose.msk.msra.mxu0 %vm396_vm1, %v288_v11  ;;  %334 = vmatpush3.bf16.xpose.msk.msra.mxu1 %vm396_vm1, %v288_v11 }
  0x16   :  { %296 = vmatprep.subr.msk.bf16.mxu0 %vm396_vm1, %v294_v14  ;;  %327 = vmatprep.subr.msk.bf16.mxu1 %vm396_vm1, %v294_v14 }
  0x1d   :  { %299 = vmatpush3.bf16.xpose.msk.msra.mxu0 %vm396_vm1, %v294_v14  ;;  %335 = vmatpush3.bf16.xpose.msk.msra.mxu1 %vm396_vm1, %v294_v14 }
  0x1e   :  { %302 = vmatprep.subr.msk.bf16.mxu0 %vm396_vm1, %v300_v17  ;;  %328 = vmatprep.subr.msk.bf16.mxu1 %vm396_vm1, %v300_v17 }
  0x25   :  { %305 = vmatpush3.bf16.xpose.msk.msra.mxu0 %vm396_vm1, %v300_v17  ;;  %336 = vmatpush3.bf16.xpose.msk.msra.mxu1 %vm396_vm1, %v300_v17 }
  0x26   :  { %308 = vmatprep.subr.msk.bf16.mxu0 %vm396_vm1, %v306_v20  ;;  %329 = vmatprep.subr.msk.bf16.mxu1 %vm396_vm1, %v306_v20 }
  0x2d   :  { %311 = vmatpush3.bf16.xpose.msk.msra.mxu0 %vm396_vm1, %v306_v20  ;;  %337 = vmatpush3.bf16.xpose.msk.msra.mxu1 %vm396_vm1, %v306_v20 }
  0x2e   :  { %314 = vmatprep.subr.msk.bf16.mxu0 %vm396_vm1, %v312_v23  ;;  %330 = vmatprep.subr.msk.bf16.mxu1 %vm396_vm1, %v312_v23 }
  0x35   :  { %317 = vmatpush3.bf16.xpose.msk.msra.mxu0 %vm396_vm1, %v312_v23  ;;  %338 = vmatpush3.bf16.xpose.msk.msra.mxu1 %vm396_vm1, %v312_v23 }
  0x36   :  { %320 = vmatprep.subr.msk.bf16.mxu0 %vm396_vm1, %v318_v26  ;;  %331 = vmatprep.subr.msk.bf16.mxu1 %vm396_vm1, %v318_v26 }
  0x3d   :  { %323 = vmatpush3.bf16.xpose.msk.msra.mxu0 %vm396_vm1, %v318_v26  ;;  %339 = vmatpush3.bf16.xpose.msk.msra.mxu1 %vm396_vm1, %v318_v26 }
  0x44   :  { %271 = vmatmul.mubr.msk.f32.vlgmr.msra.gmra.mrb[0].mxu0 %vm32_vm0, %v13_v27  ;;  %274 = vmatmul.mubr.msk.f32.vlgmr.msra.gmra.mrb[0].mxu1 %vm32_vm0, %v15_v28 }
 0x117   :  { %v272_v29 = vpop.f32.mrb[0].mxu0  ;;  %v275_v30 = vpop.f32.mrb[0].mxu1 }
 0x118   :  { %179 = vst [vmem:[#allocation2 + $0x8] sm:$0xff] %v272_v29  ;;  %181 = vst [vmem:[#allocation2 + $0x18] sm:$0xff] %v275_v30  ;;  %v159_v31 = vpop.f32.mrb[1].mxu0  ;;  %v169_v32 = vpop.f32.mrb[1].mxu1 }
 0x119   :  { %178 = vst [vmem:[#allocation2] sm:$0xff] %v159_v31  ;;  %180 = vst [vmem:[#allocation2 + $0x10] sm:$0xff] %v169_v32 }
 0x11a   :  { %354 = shalt.err (!%p351_p4)
}
 0x11b   :  { %s355_s24 = scalar_lea.hbm %s533_s2, 512 }
 0x11c   :  { %p356_p5 = scmp.ne.s32.totalorder %s533_s2, %s355_s24  ;;  %p359_p6 = scmp.lt.u32.totalorder %s355_s24, %s533_s2 }
 0x11e   :  { %p361_p7 = pnand %p359_p6, %p356_p5 }
 0x120   :  { %364 = shalt.err (!%p361_p7)
}
 0x121   :  { %s368_s29 = smov 128   ;;  %s369_s30 = smov 8  }
 0x122   :  { %193 = dma.vmem_to_hbm [thread:$0]  %s188_s21, 512, %s533_s2, [#allocation3], %s368_s29, %s368_s29, %s369_s30  }
 0x123   :  { %365 = dma.done.wait [#allocation3], 512  }
 0x124   :  { %366 = vsyncadd [#allocation3], 4294966784 }
 0x125   :  { %197 = vsyncpa [#allocation3], 1 }

</bundles_post_ra>
